<compile_context>
chip_gen: v5e
topology: v5e:2x2
jax: 0.10.0
libtpu: 0.0.40
codegen_flags: <defaults>
</compile_context>

<pallas_src>
import functools

import numpy as np
import jax
import jax.numpy as jnp
from jax.experimental import pallas as pl
from jax.experimental.pallas import tpu as pltpu


def _round_up(x, m):
    return ((x + m - 1) // m) * m


# ----------------------------- Pallas kernel --------------------------------
def _linear_kernel(x_ref, w_ref, b_ref, o_ref):
    # x_ref : [TM, C]   (compute dtype, e.g. bf16)  -- streamed row tile
    # w_ref : [C, 7F]   (compute dtype)             -- resident across grid
    # b_ref : [1, 7F]   (f32)                       -- resident across grid
    # o_ref : [TM, 7F]  (f32)
    acc = jnp.dot(x_ref[...], w_ref[...], preferred_element_type=jnp.float32)
    o_ref[...] = (acc + b_ref[...]).astype(o_ref.dtype)


def linear_pallas(x2d, w_t, bias, *, block_m=512,
                  compute_dtype=jnp.bfloat16,
                  vmem_budget_bytes=32 * 1024 * 1024):
    """y = x2d @ w_t + bias on the MXU, tiled & pipelined over the row dim."""
    M, C = x2d.shape
    K7 = w_t.shape[1]

    in_isz = np.dtype(compute_dtype).itemsize
    out_isz = 4  # f32 output / accumulator

    # --- choose a sublane-aligned row tile that fits the (v7x-safe) VMEM budget
    tm = min(block_m, _round_up(M, 8))
    tm = max(8, (tm // 8) * 8)

    def _footprint(t):
        resident = C * K7 * in_isz + K7 * 4                    # W^T + bias (single buffer)
        streamed = 2 * t * C * in_isz + 2 * t * K7 * out_isz   # double-buffered x / y tiles
        return resident + streamed

    while tm > 8 and _footprint(tm) > vmem_budget_bytes:
        tm = max(8, (tm // 2 // 8) * 8)

    m_pad = _round_up(M, tm)

    x2d = x2d.astype(compute_dtype)
    if m_pad != M:
        x2d = jnp.pad(x2d, ((0, m_pad - M), (0, 0)))
    w_t = w_t.astype(compute_dtype)
    b2d = bias.reshape(1, K7).astype(jnp.float32)

    vmem_limit = int(min(max(2 * _footprint(tm), 16 * 1024 * 1024),
                         48 * 1024 * 1024))

    y = pl.pallas_call(
        _linear_kernel,
        out_shape=jax.ShapeDtypeStruct((m_pad, K7), jnp.float32),
        grid=(m_pad // tm,),
        in_specs=[
            pl.BlockSpec((tm, C), lambda i: (i, 0)),   # streamed x row tile
            pl.BlockSpec((C, K7), lambda i: (0, 0)),   # resident W^T
            pl.BlockSpec((1, K7), lambda i: (0, 0)),   # resident bias
        ],
        out_specs=pl.BlockSpec((tm, K7), lambda i: (i, 0)),
        compiler_params=pltpu.CompilerParams(
            dimension_semantics=("parallel",),         # shard row tiles across TCs (v7x)
            vmem_limit_bytes=vmem_limit),
    )(x2d, w_t, b2d)

    return y if m_pad == M else y[:M]


# ---------------------------- forward (module) -------------------------------
def _maybe_concrete(idx):
    """Return a numpy copy of `idx` if it is concrete (module config), else None."""
    try:
        return np.asarray(idx)
    except Exception:
        return None


def upconv_layer_forward(x, weight, bias, upconv_top_index, upconv_down_index,
                         out_feats, *, block_m=512, compute_dtype=jnp.bfloat16):
    """JAX/Pallas port of upconv_layer.forward.

    x      : [raw_nodes, in_feats, batch]   float32
    weight : [7*out_feats, in_feats]        (torch nn.Linear weight layout)
    bias   : [7*out_feats]
    returns: [4*raw_nodes - 6, out_feats, batch]
    """
    N = x.shape[0]
    B = x.shape[2]
    F = out_feats

    # torch: transpose(1,2) then transpose(1,0)  ->  [batch, raw_nodes, in_feats]
    xt = jnp.transpose(x, (2, 0, 1))
    C = xt.shape[2]

    # Hot path: the Linear layer on the MXU (tiled, double-buffered, bf16 in / f32 out).
    y2d = linear_pallas(xt.reshape(B * N, C), weight.T, bias,
                        block_m=block_m, compute_dtype=compute_dtype)   # [B*N, 7F]

    # [B, N*7, F] and [B, N, 7, F] are both free (row-major) reshapes of [B*N, 7F].
    y_flat = y2d.reshape(B, N * 7, F)

    # x1: exploit the canonical top index (7*n) as a static slice (no gather).
    top_np = _maybe_concrete(upconv_top_index)
    if (top_np is not None and top_np.shape[0] == N
            and np.array_equal(top_np, 7 * np.arange(N, dtype=top_np.dtype))):
        x1 = y2d.reshape(B, N, 7, F)[:, :, 0, :]                        # [B, N, F]
    else:
        x1 = y_flat[:, jnp.asarray(upconv_top_index)]                   # general gather

    # TODO(synk): the data-dependent row gather over the 7N-row intermediate
    # (upconv_down_index) + pair-mean is left to XLA; a Pallas version would need
    # per-row DMA gather, which is not block-rectangular and not worthwhile here.
    x2 = y_flat[:, jnp.asarray(upconv_down_index)].reshape(B, -1, F, 2)
    out = jnp.concatenate([x1, jnp.mean(x2, axis=3)], axis=1)           # [B, 4N-6, F]

    # torch: transpose(0,1) then transpose(1,2)  ->  [new_nodes, out_feats, batch]
    return jnp.transpose(out, (1, 2, 0))


# ------------------------- pure-JAX reference check --------------------------
def _reference(x, weight, bias, top_idx, down_idx, out_feats,
               compute_dtype=jnp.bfloat16):
    xt = jnp.transpose(x, (2, 0, 1))
    y = jnp.dot(xt.astype(compute_dtype), weight.T.astype(compute_dtype),
                preferred_element_type=jnp.float32) + bias
    B = y.shape[0]
    y = y.reshape(B, -1, out_feats)
    x1 = y[:, top_idx]
    x2 = y[:, down_idx].reshape(B, -1, out_feats, 2)
    out = jnp.concatenate([x1, jnp.mean(x2, axis=3)], axis=1)
    return jnp.transpose(out, (1, 2, 0))


if __name__ == "__main__":
    master = jax.random.PRNGKey(0)

    def run_case(key, raw_nodes, in_feats, out_feats, batch,
                 shuffle_top=False, block_m=512):
        k_x, k_w, k_b, k_down, k_perm = jax.random.split(key, 5)
        new_nodes = raw_nodes * 4 - 6

        top = jnp.arange(raw_nodes, dtype=jnp.int32) * 7
        if shuffle_top:
            top = jax.random.permutation(k_perm, top)   # exercises general gather path
        n_down = (new_nodes - raw_nodes) * 2
        down = jax.random.randint(k_down, (n_down,), 0, raw_nodes * 7,
                                  dtype=jnp.int32)

        weight = jax.random.normal(k_w, (7 * out_feats, in_feats), jnp.float32) * 0.1
        bias = jax.random.normal(k_b, (7 * out_feats,), jnp.float32) * 0.1
        x = jax.random.normal(k_x, (raw_nodes, in_feats, batch), jnp.float32)

        fwd = jax.jit(functools.partial(
            upconv_layer_forward,
            upconv_top_index=np.asarray(top),
            upconv_down_index=np.asarray(down),
            out_feats=out_feats,
            block_m=block_m))
        out = jax.block_until_ready(fwd(x, weight, bias))
        assert out.shape == (new_nodes, out_feats, batch), out.shape

        ref = _reference(x, weight, bias, top, down, out_feats)
        err = float(jnp.max(jnp.abs(out - ref)))
        assert jnp.allclose(out, ref, atol=1e-4, rtol=1e-4), err
        return out

    k1, k2 = jax.random.split(master)
    # Icosahedron level-0 mesh: 12 nodes -> 42 nodes (canonical 7*n top index; fast path).
    run_case(k1, raw_nodes=12, in_feats=8, out_feats=4, batch=2)
    # Level-1 mesh: 42 nodes -> 162 nodes; shuffled top index exercises the general
    # gather fallback, and block_m=16 forces a multi-step grid + row padding.
    run_case(k2, raw_nodes=42, in_feats=8, out_feats=4, batch=2,
             shuffle_top=True, block_m=16)

    print("KERNEL_OK")
</pallas_src>

<mosaic_0001>
module attributes {stable_mosaic.version = 11 : i64} {
  func.func @_linear_kernel(%arg0: i32, %arg1: memref<24x8xbf16, #tpu.memory_space<vmem>>, %arg2: memref<8x28xbf16, #tpu.memory_space<vmem>>, %arg3: memref<1x28xf32, #tpu.memory_space<vmem>>, %arg4: memref<24x28xf32, #tpu.memory_space<vmem>>) attributes {dimension_semantics = [#tpu.dimension_semantics<parallel>], iteration_bounds = array<i64: 1>, scalar_prefetch = 0 : i64, scratch_operands = 0 : i64, tpu.core_type = #tpu.core_type<tc>, window_params = [{transform_indices = @transform_0, window_bounds = array<i64: 24, 8>}, {pipeline_mode = #tpu.pipeline_mode<synchronous>, transform_indices = @transform_1, window_bounds = array<i64: 8, 28>}, {pipeline_mode = #tpu.pipeline_mode<synchronous>, transform_indices = @transform_2, window_bounds = array<i64: 1, 28>}, {transform_indices = @transform_3, window_bounds = array<i64: 24, 28>}]} {
    %c0 = arith.constant 0 : index
    %c0_0 = arith.constant 0 : index
    %0 = vector.load %arg1[%c0, %c0_0] : memref<24x8xbf16, #tpu.memory_space<vmem>>, vector<24x8xbf16>
    %c0_1 = arith.constant 0 : index
    %c0_2 = arith.constant 0 : index
    %1 = vector.load %arg2[%c0_1, %c0_2] : memref<8x28xbf16, #tpu.memory_space<vmem>>, vector<8x28xbf16>
    %cst = arith.constant dense<0.000000e+00> : vector<24x28xf32>
    %2 = tpu.matmul %0, %1, %cst {dimension_numbers = #tpu.dot_dimension_numbers<[1], [0], [0], [1], [0, 0, 1, 1], [], []>} : vector<24x8xbf16>, vector<8x28xbf16>, vector<24x28xf32> -> vector<24x28xf32>
    %c0_3 = arith.constant 0 : index
    %c0_4 = arith.constant 0 : index
    %3 = vector.load %arg3[%c0_3, %c0_4] : memref<1x28xf32, #tpu.memory_space<vmem>>, vector<1x28xf32>
    %4 = vector.broadcast %3 : vector<1x28xf32> to vector<24x28xf32>
    %5 = arith.addf %2, %4 : vector<24x28xf32>
    %c0_5 = arith.constant 0 : index
    %c0_6 = arith.constant 0 : index
    %6 = vector.load %arg4[%c0_5, %c0_6] : memref<24x28xf32, #tpu.memory_space<vmem>>, vector<24x28xf32>
    tpu.vector_store %arg4[%c0_5, %c0_6], %5 {strides = array<i32>} : memref<24x28xf32, #tpu.memory_space<vmem>>, vector<24x28xf32>,
    return
  }
  func.func @transform_0(%arg0: i32) -> (i32, i32) {
    %c0_i32 = arith.constant 0 : i32
    %c0_i32_0 = arith.constant 0 : i32
    return %arg0, %c0_i32 : i32, i32
  }
  func.func @transform_1(%arg0: i32) -> (i32, i32) {
    %c0_i32 = arith.constant 0 : i32
    %c0_i32_0 = arith.constant 0 : i32
    %c0_i32_1 = arith.constant 0 : i32
    return %c0_i32, %c0_i32_0 : i32, i32
  }
  func.func @transform_2(%arg0: i32) -> (i32, i32) {
    %c0_i32 = arith.constant 0 : i32
    %c0_i32_0 = arith.constant 0 : i32
    %c0_i32_1 = arith.constant 0 : i32
    return %c0_i32, %c0_i32_0 : i32, i32
  }
  func.func @transform_3(%arg0: i32) -> (i32, i32) {
    %c0_i32 = arith.constant 0 : i32
    %c0_i32_0 = arith.constant 0 : i32
    return %arg0, %c0_i32 : i32, i32
  }
}

</mosaic_0001>

<bundles_post_ra>
// kernel: upconv_layer_forward.1
= control target key start
LH: loop header
LB: loop body
LE: loop exit
PB: predicated region body
PF: predicated region fallthrough
CT: control target
= control target key end

     0   :  { %vm38_vm0 = vcmask 1043456   ;;  %vm31_vm1 = vcmask 64512   ;;  %vm60_vm2 = vcmask 228352   ;;  %s118_s1 = inlined_call_operand.vmem [shape: bf16[8,28], index: 1, kind: input, shape index: {}]   ;;  %s119_s0 = inlined_call_operand.vmem [shape: bf16[24,8], index: 0, kind: input, shape index: {}]   ;;  %s120_s2 = inlined_call_operand.vmem [shape: f32[1,28], index: 2, kind: input, shape index: {}]   ;;  %s121_s3 = inlined_call_operand.vmem [shape: f32[24,28], index: 3, kind: output, shape index: {}]  }
   0x1   :  { %v18_v0 = vld [vmem:[%s118_s1] sm:$0xf]  ;;  %v17_v1 = vld [vmem:[%s119_s0 + $0x8] sm:$0xf] }
   0x2   :  { %v40_v2 = vsel %vm38_vm0, %v18_v0, 0  ;;  %v74_v3 = vld [vmem:[%s119_s0] sm:$0xff]  ;;  %v28_v4 = vunpack.c.l.b16 %v17_v1 }
   0x3   :  { %49 = vmatpush.bf16.msra.mxu0 %v40_v2  ;;  %75 = vmatpush.bf16.msra.mxu1 %v40_v2  ;;  %v76_v6 = vld [vmem:[%s120_s2] ss:$0 sm:$0xff] }
   0x4   :  { %v30_v5 = vpack.c.b16 %v28_v4, %v28_v4 }
   0x6   :  { %72 = vmatmul.msk.bf16.vlgmr.msra.gmra.mxu0 %vm31_vm1, %v74_v3  ;;  %73 = vmatmul.msk.bf16.vlgmr.msra.gmra.mxu1 %vm31_vm1, %v30_v5 }
  0x83   :  { %v51_v7 = vpop.f32.mrf.mxu0  ;;  %v56_v8 = vpop.f32.mrf.mxu1 }
  0x84   :  { %v52_v9 = vadd.f32 %v76_v6, %v51_v7  ;;  %v57_v10 = vadd.f32 %v76_v6, %v56_v8 }
  0x86   :  { %61 = vst.msk [vmem:[%s121_s3] sm:$0xff] %vm60_vm2, %v52_v9 }
  0x87   :  { %63 = vst.msk [vmem:[%s121_s3 + $0x10] sm:$0xff] %vm60_vm2, %v57_v10 }
  0x8b   :  { %v53_v11 = vpop.f32.mrf.mxu0  ;;  %v58_v12 = vpop.f32.mrf.mxu1 }
  0x8c   :  { %v54_v13 = vadd.f32 %v76_v6, %v53_v11 }
  0x8e   :  { %62 = vst.msk [vmem:[%s121_s3 + $0x8] sm:$0xff] %vm60_vm2, %v54_v13 }

</bundles_post_ra>
